<compile_context>
chip_gen: v6e
topology: v6e:2x2x1
jax: 0.10.0
libtpu: 0.0.40
codegen_flags: <defaults>
</compile_context>

<pallas_src>
import functools

import jax
import jax.numpy as jnp
from jax import lax
from jax.experimental import pallas as pl
from jax.experimental.pallas import tpu as pltpu

_LANES = 128  # class dimension padded to one full vreg lane width


def _round_up(v, m):
    return (v + m - 1) // m * m


# ---------------------------------------------------------------------------
# Kernel 1: z0 = relu(x @ W1 + b1) @ W2 + b2    (dropout: eval -> identity)
# ---------------------------------------------------------------------------
def _mlp_kernel(x_ref, w1_ref, b1_ref, w2_ref, b2_ref, z0_ref):
    h = jnp.dot(x_ref[...], w1_ref[...], preferred_element_type=jnp.float32)
    h = jnp.maximum(h + b1_ref[...], 0.0)
    # TODO(synk): training-mode dropout (stateful PRNG mask) not applied here.
    z0 = jnp.dot(h.astype(jnp.bfloat16), w2_ref[...],
                 preferred_element_type=jnp.float32) + b2_ref[...]
    z0_ref[...] = z0


# ---------------------------------------------------------------------------
# Kernel 2: K steps of z <- (1-a) * A_hat @ z + a * z0, then log_softmax.
# ---------------------------------------------------------------------------
def _appnp_kernel(z0_ref, a_ref, out_ref, z_even, z_odd, acc_ref,
                  *, alpha, num_classes, tile):
    kk = pl.program_id(0)            # propagation iteration (sequential)
    i = pl.program_id(1)             # output row block
    j = pl.program_id(2)             # reduction block over A_hat columns
    n_k = pl.num_programs(0)
    n_j = pl.num_programs(2)

    # Seed the resident propagation state with z0 at the very first grid step.
    @pl.when((kk == 0) & (i == 0) & (j == 0))
    def _():
        z_even[...] = z0_ref[...].astype(z_even.dtype)

    # Zero the row-block accumulator at the start of each reduction sweep.
    @pl.when(j == 0)
    def _():
        acc_ref[...] = jnp.zeros_like(acc_ref)

    # acc += A_hat[i-block, j-block] @ z_old[j-block]   (bf16 MXU, f32 acc)
    k_is_even = (kk % 2) == 0
    col = pl.ds(pl.multiple_of(j * tile, tile), tile)
    z_chunk = jnp.where(k_is_even, z_even[col, :], z_odd[col, :])
    acc_ref[...] += jnp.dot(a_ref[...], z_chunk,
                            preferred_element_type=jnp.float32)

    # Finalize this row block once the reduction over j is complete.
    @pl.when(j == n_j - 1)
    def _():
        row = pl.ds(pl.multiple_of(i * tile, tile), tile)
        z_new = (1.0 - alpha) * acc_ref[...] + alpha * z0_ref[row, :]

        @pl.when((kk < n_k - 1) & k_is_even)
        def _():
            z_odd[row, :] = z_new.astype(z_odd.dtype)

        @pl.when((kk < n_k - 1) & jnp.logical_not(k_is_even))
        def _():
            z_even[row, :] = z_new.astype(z_even.dtype)

        # Last iteration: fused log_softmax masked to the real classes.
        @pl.when(kk == n_k - 1)
        def _():
            lane = lax.broadcasted_iota(jnp.int32, z_new.shape, 1)
            valid = lane < num_classes
            zm = jnp.where(valid, z_new, jnp.full_like(z_new, -1e30))
            m = jnp.max(zm, axis=1, keepdims=True)
            e = jnp.where(valid, jnp.exp(zm - m), 0.0)
            lse = jnp.log(jnp.sum(e, axis=1, keepdims=True))
            out_ref[row, :] = z_new - m - lse


# ---------------------------------------------------------------------------
# Wrapper: padding, tiling, two pallas_calls.
# ---------------------------------------------------------------------------
def appnp_net_forward(x, w1, b1, w2, b2, a_hat, *, k, alpha):
    n, f = x.shape
    hidden = w1.shape[1]
    c = w2.shape[1]
    cp = _LANES
    h_pad = _round_up(hidden, _LANES)

    # Propagation tile.  Double-buffered bf16 A tile = 2*T*T*2 bytes (1 MiB at
    # T=512); resident z0/out/z_even/z_odd cost ~1.5 KiB per padded node, so
    # this fits the 64 MiB v7x VMEM (and v5e/v6e 128 MiB) with large margin.
    tile = 512 if n > 512 else _LANES
    n_pad = _round_up(n, tile)
    n_blocks = n_pad // tile
    vmem_limit = 64 * 1024 * 1024

    f32 = jnp.float32
    x_p = jnp.zeros((n_pad, f), f32).at[:n, :].set(x.astype(f32))
    w1_p = jnp.zeros((f, h_pad), f32).at[:, :hidden].set(w1.astype(f32))
    b1_p = jnp.zeros((1, h_pad), f32).at[0, :hidden].set(
        b1.reshape(-1).astype(f32))
    w2_p = jnp.zeros((h_pad, cp), f32).at[:hidden, :c].set(
        w2.astype(f32)).astype(jnp.bfloat16)
    b2_p = jnp.zeros((1, cp), f32).at[0, :c].set(b2.reshape(-1).astype(f32))
    a_p = jnp.zeros((n_pad, n_pad), f32).at[:n, :n].set(
        a_hat.astype(f32)).astype(jnp.bfloat16)

    # ---- Kernel 1: MLP -> z0 (padded to 128 class lanes) ----
    z0_pad = pl.pallas_call(
        _mlp_kernel,
        out_shape=jax.ShapeDtypeStruct((n_pad, cp), f32),
        grid_spec=pltpu.PrefetchScalarGridSpec(
            num_scalar_prefetch=0,
            grid=(n_blocks,),
            in_specs=[
                pl.BlockSpec((tile, f), lambda i: (i, 0)),
                pl.BlockSpec((f, h_pad), lambda i: (0, 0)),
                pl.BlockSpec((1, h_pad), lambda i: (0, 0)),
                pl.BlockSpec((h_pad, cp), lambda i: (0, 0)),
                pl.BlockSpec((1, cp), lambda i: (0, 0)),
            ],
            out_specs=pl.BlockSpec((tile, cp), lambda i: (i, 0)),
        ),
        compiler_params=pltpu.CompilerParams(
            dimension_semantics=("parallel",),
            vmem_limit_bytes=vmem_limit),
        cost_estimate=pl.CostEstimate(
            flops=2 * n_pad * f * h_pad + 2 * n_pad * h_pad * cp,
            transcendentals=0,
            bytes_accessed=4 * (n_pad * f + f * h_pad + n_pad * cp)
            + 2 * h_pad * cp),
    )(x_p, w1_p, b1_p, w2_p, b2_p)

    if k <= 0:  # degenerate K=0: no propagation, plain log_softmax
        return jax.nn.log_softmax(z0_pad[:n, :c], axis=1)

    # ---- Kernel 2: APPNP propagation + fused log_softmax ----
    prop_kernel = functools.partial(
        _appnp_kernel, alpha=float(alpha), num_classes=c, tile=tile)
    out_pad = pl.pallas_call(
        prop_kernel,
        out_shape=jax.ShapeDtypeStruct((n_pad, cp), f32),
        grid_spec=pltpu.PrefetchScalarGridSpec(
            num_scalar_prefetch=0,
            grid=(k, n_blocks, n_blocks),
            in_specs=[
                pl.BlockSpec((n_pad, cp), lambda kk, i, j: (0, 0)),   # z0 resident
                pl.BlockSpec((tile, tile), lambda kk, i, j: (i, j)),  # A_hat tile
            ],
            out_specs=pl.BlockSpec((n_pad, cp), lambda kk, i, j: (0, 0)),
            scratch_shapes=[
                pltpu.VMEM((n_pad, cp), jnp.bfloat16),   # z state (even iters)
                pltpu.VMEM((n_pad, cp), jnp.bfloat16),   # z state (odd iters)
                pltpu.VMEM((tile, cp), jnp.float32),     # row-block accumulator
            ],
        ),
        compiler_params=pltpu.CompilerParams(
            dimension_semantics=("arbitrary", "arbitrary", "arbitrary"),
            vmem_limit_bytes=vmem_limit),
        cost_estimate=pl.CostEstimate(
            flops=2 * k * n_pad * n_pad * cp,
            transcendentals=n_pad * cp,
            bytes_accessed=k * n_pad * n_pad * 2 + 3 * n_pad * cp * 4),
    )(z0_pad, a_p)

    return out_pad[:n, :c]


def build_gcn_norm_adjacency(edge_index, num_nodes):
    """Dense PyG gcn_norm with unit edge weights: duplicate edges scatter-add,
    self-loops get weight 1 (existing ones are not double-counted), then
    symmetric D^-1/2 (A + I) D^-1/2 with messages flowing src -> dst."""
    src, dst = edge_index[0], edge_index[1]
    w = jnp.where(src == dst, 0.0, 1.0)            # drop explicit self-loops
    a = jnp.zeros((num_nodes, num_nodes), jnp.float32)
    a = a.at[dst, src].add(w)                      # scatter-add keeps duplicates
    a = a + jnp.eye(num_nodes, dtype=jnp.float32)  # unit self-loop on every node
    deg = jnp.sum(a, axis=1)
    dinv = jnp.where(deg > 0, lax.rsqrt(deg), 0.0)
    return dinv[:, None] * a * dinv[None, :]


if __name__ == "__main__":
    # Small synthetic problem consistent with the module's __init__.
    num_nodes = 32
    features = 16
    hidden = 32
    classes = 8
    K = 10
    ALPHA = 0.1
    # dropout p = 0.5 but module is evaluated in inference mode -> identity.

    key = jax.random.PRNGKey(0)
    kx, ke, kw1, kb1, kw2, kb2 = jax.random.split(key, 6)

    x = jax.random.normal(kx, (num_nodes, features), jnp.float32)
    num_edges = 64
    edge_index = jax.random.randint(ke, (2, num_edges), 0, num_nodes)
    a_hat = build_gcn_norm_adjacency(edge_index, num_nodes)

    # Parameters stored pre-transposed as [in, out].
    w1 = jax.random.normal(kw1, (features, hidden), jnp.float32) * 0.1
    b1 = jax.random.normal(kb1, (hidden,), jnp.float32) * 0.1
    w2 = jax.random.normal(kw2, (hidden, classes), jnp.float32) * 0.1
    b2 = jax.random.normal(kb2, (classes,), jnp.float32) * 0.1

    out = appnp_net_forward(x, w1, b1, w2, b2, a_hat, k=K, alpha=ALPHA)
    out = jax.block_until_ready(out)

    # Reference 1: mirrors the kernel's bf16 matmul inputs (tight tolerance).
    h_ref = jnp.maximum(x @ w1 + b1[None, :], 0.0)
    z0_bf = jnp.dot(h_ref.astype(jnp.bfloat16), w2.astype(jnp.bfloat16),
                    preferred_element_type=jnp.float32) + b2[None, :]
    a_bf = a_hat.astype(jnp.bfloat16)
    z = z0_bf
    for _ in range(K):
        z = (1.0 - ALPHA) * jnp.dot(a_bf, z.astype(jnp.bfloat16),
                                    preferred_element_type=jnp.float32) \
            + ALPHA * z0_bf
    ref_bf = jax.nn.log_softmax(z, axis=1)
    assert jnp.allclose(out, ref_bf, atol=5e-3, rtol=5e-3), \
        float(jnp.max(jnp.abs(out - ref_bf)))

    # Reference 2: full f32 semantics of the original module (loose tolerance,
    # covers the intentional bf16 rounding of A_hat / h).
    z0_f32 = h_ref @ w2 + b2[None, :]
    z = z0_f32
    for _ in range(K):
        z = (1.0 - ALPHA) * (a_hat @ z) + ALPHA * z0_f32
    ref_f32 = jax.nn.log_softmax(z, axis=1)
    assert jnp.allclose(out, ref_f32, atol=5e-2, rtol=5e-2), \
        float(jnp.max(jnp.abs(out - ref_f32)))

    print("KERNEL_OK")
</pallas_src>

<mosaic_0001>
module attributes {stable_mosaic.version = 11 : i64} {
  func.func @_mlp_kernel(%arg0: i32, %arg1: memref<128x16xf32, #tpu.memory_space<vmem>>, %arg2: memref<16x128xf32, #tpu.memory_space<vmem>>, %arg3: memref<1x128xf32, #tpu.memory_space<vmem>>, %arg4: memref<128x128xbf16, #tpu.memory_space<vmem>>, %arg5: memref<1x128xf32, #tpu.memory_space<vmem>>, %arg6: memref<128x128xf32, #tpu.memory_space<vmem>>) attributes {dimension_semantics = [#tpu.dimension_semantics<parallel>], iteration_bounds = array<i64: 1>, scalar_prefetch = 0 : i64, scratch_operands = 0 : i64, tpu.core_type = #tpu.core_type<tc>, window_params = [{transform_indices = @transform_0, window_bounds = array<i64: 128, 16>}, {pipeline_mode = #tpu.pipeline_mode<synchronous>, transform_indices = @transform_1, window_bounds = array<i64: 16, 128>}, {pipeline_mode = #tpu.pipeline_mode<synchronous>, transform_indices = @transform_2, window_bounds = array<i64: 1, 128>}, {pipeline_mode = #tpu.pipeline_mode<synchronous>, transform_indices = @transform_3, window_bounds = array<i64: 128, 128>}, {pipeline_mode = #tpu.pipeline_mode<synchronous>, transform_indices = @transform_4, window_bounds = array<i64: 1, 128>}, {transform_indices = @transform_5, window_bounds = array<i64: 128, 128>}]} {
    %c0 = arith.constant 0 : index
    %c0_0 = arith.constant 0 : index
    %0 = vector.load %arg1[%c0, %c0_0] : memref<128x16xf32, #tpu.memory_space<vmem>>, vector<128x16xf32>
    %c0_1 = arith.constant 0 : index
    %c0_2 = arith.constant 0 : index
    %1 = vector.load %arg2[%c0_1, %c0_2] : memref<16x128xf32, #tpu.memory_space<vmem>>, vector<16x128xf32>
    %cst = arith.constant dense<0.000000e+00> : vector<128x128xf32>
    %2 = tpu.matmul %0, %1, %cst {dimension_numbers = #tpu.dot_dimension_numbers<[1], [0], [0], [1], [0, 0, 1, 1], [], []>} : vector<128x16xf32>, vector<16x128xf32>, vector<128x128xf32> -> vector<128x128xf32>
    %c0_3 = arith.constant 0 : index
    %c0_4 = arith.constant 0 : index
    %3 = vector.load %arg3[%c0_3, %c0_4] : memref<1x128xf32, #tpu.memory_space<vmem>>, vector<1x128xf32>
    %4 = vector.broadcast %3 : vector<1x128xf32> to vector<128x128xf32>
    %5 = arith.addf %2, %4 : vector<128x128xf32>
    %cst_5 = arith.constant 0.000000e+00 : f32
    %6 = vector.broadcast %cst_5 : f32 to vector<128x128xf32>
    %7 = arith.maximumf %5, %6 : vector<128x128xf32>
    %8 = arith.truncf %7 : vector<128x128xf32> to vector<128x128xbf16>
    %c0_6 = arith.constant 0 : index
    %c0_7 = arith.constant 0 : index
    %9 = vector.load %arg4[%c0_6, %c0_7] : memref<128x128xbf16, #tpu.memory_space<vmem>>, vector<128x128xbf16>
    %cst_8 = arith.constant dense<0.000000e+00> : vector<128x128xf32>
    %10 = tpu.matmul %8, %9, %cst_8 {dimension_numbers = #tpu.dot_dimension_numbers<[1], [0], [0], [1], [0, 0, 1, 1], [], []>} : vector<128x128xbf16>, vector<128x128xbf16>, vector<128x128xf32> -> vector<128x128xf32>
    %c0_9 = arith.constant 0 : index
    %c0_10 = arith.constant 0 : index
    %11 = vector.load %arg5[%c0_9, %c0_10] : memref<1x128xf32, #tpu.memory_space<vmem>>, vector<1x128xf32>
    %12 = vector.broadcast %11 : vector<1x128xf32> to vector<128x128xf32>
    %13 = arith.addf %10, %12 : vector<128x128xf32>
    %c0_11 = arith.constant 0 : index
    %c0_12 = arith.constant 0 : index
    %14 = vector.load %arg6[%c0_11, %c0_12] : memref<128x128xf32, #tpu.memory_space<vmem>>, vector<128x128xf32>
    tpu.vector_store %arg6[%c0_11, %c0_12], %13 {strides = array<i32>} : memref<128x128xf32, #tpu.memory_space<vmem>>, vector<128x128xf32>,
    return
  }
  func.func @transform_0(%arg0: i32) -> (i32, i32) {
    %c0_i32 = arith.constant 0 : i32
    %c0_i32_0 = arith.constant 0 : i32
    return %arg0, %c0_i32 : i32, i32
  }
  func.func @transform_1(%arg0: i32) -> (i32, i32) {
    %c0_i32 = arith.constant 0 : i32
    %c0_i32_0 = arith.constant 0 : i32
    %c0_i32_1 = arith.constant 0 : i32
    return %c0_i32, %c0_i32_0 : i32, i32
  }
  func.func @transform_2(%arg0: i32) -> (i32, i32) {
    %c0_i32 = arith.constant 0 : i32
    %c0_i32_0 = arith.constant 0 : i32
    %c0_i32_1 = arith.constant 0 : i32
    return %c0_i32, %c0_i32_0 : i32, i32
  }
  func.func @transform_3(%arg0: i32) -> (i32, i32) {
    %c0_i32 = arith.constant 0 : i32
    %c0_i32_0 = arith.constant 0 : i32
    %c0_i32_1 = arith.constant 0 : i32
    return %c0_i32, %c0_i32_0 : i32, i32
  }
  func.func @transform_4(%arg0: i32) -> (i32, i32) {
    %c0_i32 = arith.constant 0 : i32
    %c0_i32_0 = arith.constant 0 : i32
    %c0_i32_1 = arith.constant 0 : i32
    return %c0_i32, %c0_i32_0 : i32, i32
  }
  func.func @transform_5(%arg0: i32) -> (i32, i32) {
    %c0_i32 = arith.constant 0 : i32
    %c0_i32_0 = arith.constant 0 : i32
    return %arg0, %c0_i32 : i32, i32
  }
}

</mosaic_0001>

<bundles_post_ra>
// kernel: tpu_custom_call.1
= control target key start
LH: loop header
LB: loop body
LE: loop exit
PB: predicated region body
PF: predicated region fallthrough
CT: control target
= control target key end

     0   :  { %vm47_vm0 = vcmask 130048   ;;  %s770_s0 = inlined_call_operand.vmem [shape: f32[128,16], index: 0, kind: input, shape index: {}]   ;;  %s771_s1 = inlined_call_operand.vmem [shape: f32[16,128], index: 1, kind: input, shape index: {}]   ;;  %s772_s2 = inlined_call_operand.vmem [shape: f32[1,128], index: 2, kind: input, shape index: {}]   ;;  %s773_s3 = inlined_call_operand.vmem [shape: bf16[128,128], index: 3, kind: input, shape index: {}]   ;;  %s774_s4 = inlined_call_operand.vmem [shape: f32[1,128], index: 4, kind: input, shape index: {}]   ;;  %s775_s5 = inlined_call_operand.hbm [shape: f32[128,128], index: 5, kind: output, shape index: {}]  }
   0x1   :  { %v39_v0 = vld [vmem:[%s771_s1 + $0x8] sm:$0xff]  ;;  %v38_v1 = vld [vmem:[%s771_s1] sm:$0xff]  ;;  %v24_v4 = vld [vmem:[%s770_s0 + $0x10] sm:$0xff] }
   0x2   :  { %v22_v2 = vld [vmem:[%s770_s0] sm:$0xff]  ;;  %525 = vmatprep.subr.mxu0 %v39_v0  ;;  %v23_v3 = vld [vmem:[%s770_s0 + $0x8] sm:$0xff]  ;;  %v25_v5 = vld [vmem:[%s770_s0 + $0x18] sm:$0xff] }
   0x3   :  { %529 = vmatprep.mubr.msk.f32.mxu0 %vm47_vm0, %v22_v2  ;;  %526 = vmatpush3.msra.mxu0 %v39_v0  ;;  %v26_v6 = vld [vmem:[%s770_s0 + $0x20] sm:$0xff]  ;;  %v604_v7 = vld [vmem:[%s773_s3 + $0x38] sm:$0xff]   ;;  %v605_v8 = vld [vmem:[%s773_s3 + $0x30] sm:$0xff]  }
   0x4   :  { %527 = vmatprep.subr.mxu0 %v38_v1  ;;  %v27_v9 = vld [vmem:[%s770_s0 + $0x28] sm:$0xff]  ;;  %585 = vmatprep.subr.bf16.mxu1 %v604_v7  ;;  %v28_v10 = vld [vmem:[%s770_s0 + $0x30] sm:$0xff] }
   0x5   :  { %528 = vmatpush3.msra.mxu0 %v38_v1  ;;  %593 = vmatpush3.bf16.msra.mxu1 %v604_v7  ;;  %v606_v11 = vld [vmem:[%s773_s3 + $0x28] sm:$0xff]  }
   0x6   :  { %530 = vmatmul.mubr.msk.f32.vlgmr.msra.gmra.mxu0 %vm47_vm0, %v23_v3  ;;  %553 = vmatprep.subr.bf16.mxu0 %v604_v7 }
   0x7   :  { %532 = vmatprep.mubr.msk.f32.mxu0 %vm47_vm0, %v24_v4  ;;  %554 = vmatpush3.bf16.msra.mxu0 %v604_v7 }
   0x8   :  { %555 = vmatprep.subr.bf16.mxu0 %v605_v8  ;;  %586 = vmatprep.subr.bf16.mxu1 %v605_v8 }
   0x9   :  { %594 = vmatpush3.bf16.msra.mxu1 %v605_v8 }
   0xa   :  { %533 = vmatmul.mubr.msk.f32.gmra.mxu0 %vm47_vm0, %v25_v5 }
   0xb   :  { %535 = vmatprep.mubr.msk.f32.mxu0 %vm47_vm0, %v26_v6 }
   0xe   :  { %536 = vmatmul.mubr.msk.f32.gmra.mxu0 %vm47_vm0, %v27_v9 }
   0xf   :  { %10 = vsyncpa [#allocation3], 0  ;;  %538 = vmatprep.mubr.msk.f32.mxu0 %vm47_vm0, %v28_v10  ;;  %v29_v12 = vld [vmem:[%s770_s0 + $0x38] sm:$0xff]  ;;  %556 = vmatpush3.bf16.msra.mxu0 %v605_v8  ;;  %v30_v13 = vld [vmem:[%s770_s0 + $0x40] sm:$0xff] }
  0x10   :  { %557 = vmatprep.subr.bf16.mxu0 %v606_v11  ;;  %v607_v14 = vld [vmem:[%s773_s3 + $0x20] sm:$0xff]   ;;  %587 = vmatprep.subr.bf16.mxu1 %v606_v11  ;;  %v31_v15 = vld [vmem:[%s770_s0 + $0x48] sm:$0xff]  ;;  %v32_v16 = vld [vmem:[%s770_s0 + $0x50] sm:$0xff] }
  0x11   :  { %595 = vmatpush3.bf16.msra.mxu1 %v606_v11  ;;  %v608_v17 = vld [vmem:[%s773_s3 + $0x18] sm:$0xff]   ;;  %v34_v19 = vld [vmem:[%s770_s0 + $0x60] sm:$0xff]  ;;  %v35_v20 = vld [vmem:[%s770_s0 + $0x68] sm:$0xff] }
  0x12   :  { %539 = vmatmul.mubr.msk.f32.gmra.mxu0 %vm47_vm0, %v29_v12  ;;  %588 = vmatprep.subr.bf16.mxu1 %v607_v14  ;;  %v33_v18 = vld [vmem:[%s770_s0 + $0x58] sm:$0xff]  ;;  %v36_v21 = vld [vmem:[%s770_s0 + $0x70] sm:$0xff]  ;;  %v610_v24 = vld [vmem:[%s773_s3 + $0x8] sm:$0xff]  }
  0x13   :  { %541 = vmatprep.mubr.msk.f32.mxu0 %vm47_vm0, %v30_v13  ;;  %558 = vmatpush3.bf16.msra.mxu0 %v606_v11  ;;  %v37_v22 = vld [vmem:[%s770_s0 + $0x78] sm:$0xff]  ;;  %v609_v23 = vld [vmem:[%s773_s3 + $0x10] sm:$0xff]   ;;  %v611_v25 = vld [vmem:[%s773_s3] sm:$0xff]  }
  0x14   :  { %559 = vmatprep.subr.bf16.mxu0 %v607_v14  ;;  %v465_v26 = vld [vmem:[%s772_s2] ss:$0 sm:$0xff] }
  0x15   :  { %596 = vmatpush3.bf16.msra.mxu1 %v607_v14 }
  0x16   :  { %542 = vmatmul.mubr.msk.f32.gmra.mxu0 %vm47_vm0, %v31_v15  ;;  %589 = vmatprep.subr.bf16.mxu1 %v608_v17 }
  0x17   :  { %544 = vmatprep.mubr.msk.f32.mxu0 %vm47_vm0, %v32_v16  ;;  %560 = vmatpush3.bf16.msra.mxu0 %v607_v14 }
  0x18   :  { %561 = vmatprep.subr.bf16.mxu0 %v608_v17 }
  0x19   :  { %597 = vmatpush3.bf16.msra.mxu1 %v608_v17 }
  0x1a   :  { %545 = vmatmul.mubr.msk.f32.gmra.mxu0 %vm47_vm0, %v33_v18  ;;  %590 = vmatprep.subr.bf16.mxu1 %v609_v23 }
  0x1b   :  { %547 = vmatprep.mubr.msk.f32.mxu0 %vm47_vm0, %v34_v19  ;;  %562 = vmatpush3.bf16.msra.mxu0 %v608_v17  ;;  %v482_v19 = vld [vmem:[%s774_s4] ss:$0 sm:$0xff]  ;;  %s634_s4 = smov [#allocation2]  }
  0x1c   :  { %563 = vmatprep.subr.bf16.mxu0 %v609_v23  ;;  %s454_s19 = sshll.u32 %s634_s4, 4  ;;  %s455_s19 = int_to_ptr.vmem [resolvable:$true] %s454_s19 }
  0x1d   :  { %598 = vmatpush3.bf16.msra.mxu1 %v609_v23  ;;  %s612_s20 = scalar_lea.vmem %s455_s19, 2048  ;;  %p617_p1 = scmp.lt.s32.totalorder %s455_s19, %s455_s19 }
  0x1e   :  { %548 = vmatmul.mubr.msk.f32.gmra.mxu0 %vm47_vm0, %v35_v20  ;;  %591 = vmatprep.subr.bf16.mxu1 %v610_v24  ;;  %p613_p0 = scmp.ne.s32.totalorder %s455_s19, %s612_s20  ;;  %p618_p2 = scmp.lt.s32.totalorder %s612_s20, %s612_s20 }
  0x1f   :  { %550 = vmatprep.mubr.msk.f32.mxu0 %vm47_vm0, %v36_v21  ;;  %564 = vmatpush3.bf16.msra.mxu0 %v609_v23 }
  0x20   :  { %565 = vmatprep.subr.bf16.mxu0 %v610_v24  ;;  %p619_p3 = por %p618_p2, %p617_p1 }
  0x21   :  { %599 = vmatpush3.bf16.msra.mxu1 %v610_v24 }
  0x22   :  { %551 = vmatmul.mubr.msk.f32.gmra.mxu0 %vm47_vm0, %v37_v22  ;;  %592 = vmatprep.subr.bf16.mxu1 %v611_v25  ;;  %p620_p4 = pnand %p619_p3, %p613_p0 }
  0x23   :  { %566 = vmatpush3.bf16.msra.mxu0 %v610_v24 }
  0x24   :  { %567 = vmatprep.subr.bf16.mxu0 %v611_v25 }
  0x25   :  { %600 = vmatpush3.bf16.msra.mxu1 %v611_v25 }
  0x27   :  { %568 = vmatpush3.bf16.msra.mxu0 %v611_v25 }
  0xc6   :  { %v531_v27 = vpop.f32.mrf.mxu0 }
  0xc7   :  { %v168_v28 = vadd.f32 %v531_v27, %v465_v26 }
  0xc8   :  { %v162_v29 = vpop.f32.mrf.mxu0 }
  0xc9   :  { %v163_v30 = vadd.f32 %v465_v26, %v162_v29  ;;  %v242_v32 = vmax.f32 %v168_v28, 0.0 }
  0xca   :  { %v534_v31 = vpop.f32.mrf.mxu0 }
  0xcb   :  { %v241_v33 = vmax.f32 %v163_v30, 0.0  ;;  %v178_v34 = vadd.f32 %v534_v31, %v465_v26 }
  0xcc   :  { %v172_v35 = vpop.f32.mrf.mxu0 }
  0xcd   :  { %v257_v36 = vpack.c.bf16 %v242_v32, %v241_v33  ;;  %v173_v37 = vadd.f32 %v465_v26, %v172_v35  ;;  %v244_v39 = vmax.f32 %v178_v34, 0.0 }
  0xce   :  { %v537_v38 = vpop.f32.mrf.mxu0 }
  0xcf   :  { %v243_v40 = vmax.f32 %v173_v37, 0.0  ;;  %v188_v41 = vadd.f32 %v537_v38, %v465_v26  ;;  %569 = vmatprep.mubr.bf16.mxu0 %v257_v36 }
  0xd0   :  { %v182_v42 = vpop.f32.mrf.mxu0 }
  0xd1   :  { %v258_v43 = vpack.c.bf16 %v244_v39, %v243_v40  ;;  %v183_v44 = vadd.f32 %v465_v26, %v182_v42  ;;  %v246_v46 = vmax.f32 %v188_v41, 0.0 }
  0xd2   :  { %v540_v45 = vpop.f32.mrf.mxu0 }
  0xd3   :  { %v245_v47 = vmax.f32 %v183_v44, 0.0  ;;  %v198_v48 = vadd.f32 %v540_v45, %v465_v26  ;;  %570 = vmatmul.mubr.bf16.vlgmr.msra.gmra.mxu0 %v258_v43 }
  0xd4   :  { %v192_v49 = vpop.f32.mrf.mxu0 }
  0xd5   :  { %v193_v50 = vadd.f32 %v465_v26, %v192_v49  ;;  %v259_v51 = vpack.c.bf16 %v246_v46, %v245_v47  ;;  %v248_v53 = vmax.f32 %v198_v48, 0.0 }
  0xd6   :  { %v543_v52 = vpop.f32.mrf.mxu0 }
  0xd7   :  { %v247_v54 = vmax.f32 %v193_v50, 0.0  ;;  %v208_v55 = vadd.f32 %v543_v52, %v465_v26  ;;  %573 = vmatprep.mubr.bf16.mxu1 %v259_v51 }
  0xd8   :  { %v202_v56 = vpop.f32.mrf.mxu0 }
  0xd9   :  { %v260_v57 = vpack.c.bf16 %v248_v53, %v247_v54  ;;  %v203_v58 = vadd.f32 %v465_v26, %v202_v56  ;;  %v250_v60 = vmax.f32 %v208_v55, 0.0 }
  0xda   :  { %v546_v59 = vpop.f32.mrf.mxu0 }
  0xdb   :  { %v249_v61 = vmax.f32 %v203_v58, 0.0  ;;  %v218_v62 = vadd.f32 %v546_v59, %v465_v26  ;;  %574 = vmatmul.mubr.bf16.vlgmr.msra.gmra.mxu1 %v260_v57 }
  0xdc   :  { %v212_v63 = vpop.f32.mrf.mxu0 }
  0xdd   :  { %v261_v0 = vpack.c.bf16 %v250_v60, %v249_v61  ;;  %v213_v1 = vadd.f32 %v465_v26, %v212_v63  ;;  %v252_v3 = vmax.f32 %v218_v62, 0.0 }
  0xde   :  { %v549_v2 = vpop.f32.mrf.mxu0 }
  0xdf   :  { %v251_v4 = vmax.f32 %v213_v1, 0.0  ;;  %v228_v5 = vadd.f32 %v549_v2, %v465_v26  ;;  %577 = vmatprep.mubr.bf16.mxu1 %v261_v0 }
  0xe0   :  { %v222_v6 = vpop.f32.mrf.mxu0 }
  0xe1   :  { %v262_v7 = vpack.c.bf16 %v252_v3, %v251_v4  ;;  %v223_v8 = vadd.f32 %v465_v26, %v222_v6  ;;  %v254_v10 = vmax.f32 %v228_v5, 0.0 }
  0xe2   :  { %v552_v9 = vpop.f32.mrf.mxu0 }
  0xe3   :  { %v253_v11 = vmax.f32 %v223_v8, 0.0  ;;  %v238_v12 = vadd.f32 %v552_v9, %v465_v26  ;;  %578 = vmatmul.mubr.bf16.gmra.mxu1 %v262_v7 }
  0xe4   :  { %v232_v13 = vpop.f32.mrf.mxu0 }
  0xe5   :  { %v263_v14 = vpack.c.bf16 %v254_v10, %v253_v11  ;;  %v233_v15 = vadd.f32 %v465_v26, %v232_v13  ;;  %v256_v16 = vmax.f32 %v238_v12, 0.0 }
  0xe7   :  { %v255_v17 = vmax.f32 %v233_v15, 0.0  ;;  %581 = vmatprep.mubr.bf16.mxu1 %v263_v14 }
  0xe9   :  { %v264_v18 = vpack.c.bf16 %v256_v16, %v255_v17 }
  0xeb   :  { %582 = vmatmul.mubr.bf16.gmra.mxu1 %v264_v18 }
 0x193   :  { %v571_v20 = vpop.f32.mrf.mxu0 }
 0x194   :  { %v379_v21 = vadd.f32 %v571_v20, %v482_v19 }
 0x195   :  { %v370_v22 = vpop.f32.mrf.mxu0 }
 0x196   :  { %435 = vst [vmem:[#allocation2 + $0x10] sm:$0xff] %v379_v21  ;;  %v371_v23 = vadd.f32 %v482_v19, %v370_v22 }
 0x197   :  { %v572_v24 = vpop.f32.mrf.mxu0 }
 0x198   :  { %433 = vst [vmem:[#allocation2] sm:$0xff] %v371_v23  ;;  %v382_v25 = vadd.f32 %v572_v24, %v482_v19 }
 0x199   :  { %v373_v27 = vpop.f32.mrf.mxu0 }
 0x19a   :  { %436 = vst [vmem:[#allocation2 + $0x18] sm:$0xff] %v382_v25  ;;  %v374_v26 = vadd.f32 %v482_v19, %v373_v27 }
 0x19b   :  { %v575_v28 = vpop.f32.mrf.mxu1 }
 0x19c   :  { %434 = vst [vmem:[#allocation2 + $0x8] sm:$0xff] %v374_v26  ;;  %v395_v29 = vadd.f32 %v575_v28, %v482_v19 }
 0x19d   :  { %v386_v30 = vpop.f32.mrf.mxu1 }
 0x19e   :  { %439 = vst [vmem:[#allocation2 + $0x30] sm:$0xff] %v395_v29  ;;  %v387_v31 = vadd.f32 %v482_v19, %v386_v30 }
 0x19f   :  { %v576_v32 = vpop.f32.mrf.mxu1 }
 0x1a0   :  { %437 = vst [vmem:[#allocation2 + $0x20] sm:$0xff] %v387_v31  ;;  %v398_v33 = vadd.f32 %v576_v32, %v482_v19 }
 0x1a1   :  { %v389_v34 = vpop.f32.mrf.mxu1 }
 0x1a2   :  { %440 = vst [vmem:[#allocation2 + $0x38] sm:$0xff] %v398_v33  ;;  %v390_v35 = vadd.f32 %v482_v19, %v389_v34 }
 0x1a3   :  { %v579_v36 = vpop.f32.mrf.mxu1 }
 0x1a4   :  { %438 = vst [vmem:[#allocation2 + $0x28] sm:$0xff] %v390_v35  ;;  %v411_v37 = vadd.f32 %v579_v36, %v482_v19 }
 0x1a5   :  { %v402_v38 = vpop.f32.mrf.mxu1 }
 0x1a6   :  { %443 = vst [vmem:[#allocation2 + $0x50] sm:$0xff] %v411_v37  ;;  %v403_v39 = vadd.f32 %v482_v19, %v402_v38 }
 0x1a7   :  { %v580_v40 = vpop.f32.mrf.mxu1 }
 0x1a8   :  { %441 = vst [vmem:[#allocation2 + $0x40] sm:$0xff] %v403_v39  ;;  %v414_v41 = vadd.f32 %v580_v40, %v482_v19 }
 0x1a9   :  { %v405_v42 = vpop.f32.mrf.mxu1 }
 0x1aa   :  { %444 = vst [vmem:[#allocation2 + $0x58] sm:$0xff] %v414_v41  ;;  %v406_v43 = vadd.f32 %v482_v19, %v405_v42 }
 0x1ab   :  { %v583_v44 = vpop.f32.mrf.mxu1 }
 0x1ac   :  { %442 = vst [vmem:[#allocation2 + $0x48] sm:$0xff] %v406_v43  ;;  %v427_v45 = vadd.f32 %v583_v44, %v482_v19 }
 0x1ad   :  { %v418_v46 = vpop.f32.mrf.mxu1 }
 0x1ae   :  { %447 = vst [vmem:[#allocation2 + $0x70] sm:$0xff] %v427_v45  ;;  %v419_v47 = vadd.f32 %v482_v19, %v418_v46 }
 0x1af   :  { %v584_v48 = vpop.f32.mrf.mxu1 }
 0x1b0   :  { %445 = vst [vmem:[#allocation2 + $0x60] sm:$0xff] %v419_v47  ;;  %v430_v49 = vadd.f32 %v584_v48, %v482_v19 }
 0x1b1   :  { %v421_v50 = vpop.f32.mrf.mxu1 }
 0x1b2   :  { %448 = vst [vmem:[#allocation2 + $0x78] sm:$0xff] %v430_v49  ;;  %v422_v51 = vadd.f32 %v482_v19, %v421_v50 }
 0x1b4   :  { %446 = vst [vmem:[#allocation2 + $0x68] sm:$0xff] %v422_v51 }
 0x1b5   :  { %623 = shalt.err (!%p620_p4)
}
 0x1b6   :  { %s635_s21 = smov 128   ;;  %s636_s22 = smov 8  }
 0x1b7   :  { %460 = dma.vmem_to_hbm [thread:$0]  %s455_s19, 2048, %s775_s5, [#allocation3], %s635_s21, %s635_s21, %s636_s22  }
 0x1b8   :  { %632 = dma.done.wait [#allocation3], 2048  }
 0x1b9   :  { %633 = vsyncadd [#allocation3], 4294965248 }
 0x1ba   :  { %464 = vsyncpa [#allocation3], 1 }

</bundles_post_ra>
